<compile_context>
chip_gen: v7x
topology: tpu7x:2x2x1
jax: 0.10.0
libtpu: 0.0.40
codegen_flags: <defaults>
</compile_context>

<pallas_src>
import jax
import jax.numpy as jnp
from jax.experimental import pallas as pl
from jax.experimental.pallas import tpu as pltpu


def make_position_encoding_table(d_model, max_seq_len, dtype=jnp.float32):
    """(max_seq_len + 1, d_model) sinusoidal table with a zero pad row at index 0."""
    pos = jnp.arange(max_seq_len, dtype=jnp.float32)[:, None]          # (L, 1)
    j = jnp.arange(d_model, dtype=jnp.float32)[None, :]                # (1, D)
    angle = pos / jnp.power(10000.0, 2.0 * jnp.floor(j / 2.0) / float(d_model))
    even = (jnp.arange(d_model) % 2) == 0
    table = jnp.where(even[None, :], jnp.sin(angle), jnp.cos(angle))
    pad_row = jnp.zeros((1, d_model), dtype=table.dtype)
    return jnp.concatenate([pad_row, table], axis=0).astype(dtype)     # (L + 1, D)


def _pos_enc_kernel(len_ref, pe_ref, pad_ref, o_ref):
    # len_ref: (B,) int32 in SMEM (scalar prefetch)
    # pe_ref:  (tile_t, D)  rows [i*tile_t+1 .. i*tile_t+tile_t] of the embedding table
    # pad_ref: (1, D)       embedding row for index 0 (the pad row)
    # o_ref:   (tile_t, D)  output slab for (batch b, time tile i); batch dim squeezed
    b = pl.program_id(0)
    i = pl.program_id(1)
    tile_t, d = o_ref.shape
    seq_len = len_ref[b]
    t_idx = i * tile_t + jax.lax.broadcasted_iota(jnp.int32, (tile_t, d), 0)
    o_ref[...] = jnp.where(t_idx < seq_len, pe_ref[...], pad_ref[...]).astype(o_ref.dtype)


def positional_encoding(pe_table, input_len, *, tile_t=256):
    """pe_table: (max_seq_len + 1, D) embedding weight. input_len: (B,) or (B, 1) ints.

    Returns (B, max_len, D) with max_len = max(input_len), matching the PyTorch forward.
    """
    lens = jnp.asarray(input_len).reshape(-1).astype(jnp.int32)
    B = int(lens.shape[0])
    D = int(pe_table.shape[1])

    # PyTorch's output length is data-dependent; JAX needs static shapes, so resolve it
    # on the host (this wrapper is called outside jit).
    # TODO(synk): pass a static max_len argument to make this usable under jit.
    max_len = int(jnp.max(lens))

    tile_t = min(int(tile_t), pl.cdiv(max_len, 8) * 8)   # keep a sublane-aligned tile
    n_t = pl.cdiv(max_len, tile_t)
    padded_len = n_t * tile_t

    # Rows 1..max_len of the table (positions are t + 1), zero-padded to the tile grid.
    pe = pe_table[1:max_len + 1]
    if padded_len > max_len:
        pe = jnp.concatenate(
            [pe, jnp.zeros((padded_len - max_len, D), pe.dtype)], axis=0)
    pad_row = pe_table[0:1]                              # embedding row for pad index 0

    itemsize = jnp.dtype(pe_table.dtype).itemsize
    cost = pl.CostEstimate(
        flops=0,
        transcendentals=0,
        bytes_accessed=(2 * B * padded_len * D + D) * itemsize)

    out = pl.pallas_call(
        _pos_enc_kernel,
        out_shape=jax.ShapeDtypeStruct((B, padded_len, D), pe_table.dtype),
        grid_spec=pltpu.PrefetchScalarGridSpec(
            num_scalar_prefetch=1,                       # lengths live in SMEM
            grid=(B, n_t),
            in_specs=[
                pl.BlockSpec((tile_t, D), lambda b, i, L: (i, 0)),   # PE table slab
                pl.BlockSpec((1, D), lambda b, i, L: (0, 0)),        # pad row (resident)
            ],
            out_specs=pl.BlockSpec((None, tile_t, D), lambda b, i, L: (b, i, 0)),
        ),
        compiler_params=pltpu.CompilerParams(
            dimension_semantics=("parallel", "parallel")),
        cost_estimate=cost,
    )(lens, pe, pad_row)

    return out[:, :max_len, :]


def _reference(pe_table, input_len):
    """Pure-JAX mirror of the PyTorch forward (explicit index build + embedding gather)."""
    lens_list = [int(v) for v in jnp.asarray(input_len).reshape(-1)]
    max_len = max(lens_list)
    pos = jnp.array(
        [[t + 1 if t < L else 0 for t in range(max_len)] for L in lens_list],
        dtype=jnp.int32)
    return jnp.take(pe_table, pos, axis=0)


if __name__ == "__main__":
    # small shapes consistent with the module: d_model=128, max_seq_len=16, batch=4
    d_model, max_seq_len, B = 128, 16, 4

    key = jax.random.PRNGKey(0)
    # input_len: (B, 1) like the PyTorch forward, lengths in [1, max_seq_len]
    input_len = jax.random.randint(key, (B, 1), 1, max_seq_len + 1)

    table = make_position_encoding_table(d_model, max_seq_len)

    out = positional_encoding(table, input_len)
    out = jax.block_until_ready(out)

    ref = _reference(table, input_len)
    max_len = int(jnp.max(input_len))
    assert out.shape == (B, max_len, d_model), out.shape
    assert jnp.allclose(out, ref, atol=1e-6, rtol=1e-6)

    print("KERNEL_OK")
</pallas_src>

<mosaic_0001>
module attributes {stable_mosaic.version = 11 : i64} {
  func.func @_pos_enc_kernel(%arg0: i32, %arg1: i32, %arg2: memref<4xi32, #tpu.memory_space<smem>>, %arg3: memref<16x128xf32, #tpu.memory_space<vmem>>, %arg4: memref<1x128xf32, #tpu.memory_space<vmem>>, %arg5: memref<1x16x128xf32, #tpu.memory_space<vmem>>) attributes {dimension_semantics = [#tpu.dimension_semantics<parallel>, #tpu.dimension_semantics<parallel>], iteration_bounds = array<i64: 4, 1>, scalar_prefetch = 1 : i64, scratch_operands = 0 : i64, tpu.core_type = #tpu.core_type<tc>, window_params = [{transform_indices = @transform_0, window_bounds = array<i64: 16, 128>}, {pipeline_mode = #tpu.pipeline_mode<synchronous>, transform_indices = @transform_1, window_bounds = array<i64: 1, 128>}, {transform_indices = @transform_2, window_bounds = array<i64: 1, 16, 128>}]} {
    %0 = arith.index_cast %arg0 : i32 to index
    %1 = memref.load %arg2[%0] : memref<4xi32, #tpu.memory_space<smem>>
    %c16_i32 = arith.constant 16 : i32
    %2 = arith.muli %arg1, %c16_i32 : i32
    %3 = tpu.iota {dimensions = array<i32: 0>} : vector<16x128xi32>
    %4 = vector.broadcast %2 : i32 to vector<16x128xi32>
    %5 = arith.addi %4, %3 : vector<16x128xi32>
    %6 = vector.broadcast %1 : i32 to vector<16x128xi32>
    %7 = arith.cmpi slt, %5, %6 : vector<16x128xi32>
    %c0 = arith.constant 0 : index
    %c0_0 = arith.constant 0 : index
    %8 = vector.load %arg3[%c0, %c0_0] : memref<16x128xf32, #tpu.memory_space<vmem>>, vector<16x128xf32>
    %c0_1 = arith.constant 0 : index
    %c0_2 = arith.constant 0 : index
    %9 = vector.load %arg4[%c0_1, %c0_2] : memref<1x128xf32, #tpu.memory_space<vmem>>, vector<1x128xf32>
    %10 = vector.shape_cast %9 : vector<1x128xf32> to vector<1x128xf32>
    %11 = vector.broadcast %10 : vector<1x128xf32> to vector<16x128xf32>
    %12 = arith.select %7, %8, %11 : vector<16x128xi1>, vector<16x128xf32>
    %c0_3 = arith.constant 0 : index
    %c0_4 = arith.constant 0 : index
    %c0_5 = arith.constant 0 : index
    %13 = vector.load %arg5[%c0_3, %c0_4, %c0_5] : memref<1x16x128xf32, #tpu.memory_space<vmem>>, vector<1x16x128xf32>
    %14 = vector.shape_cast %13 : vector<1x16x128xf32> to vector<16x128xf32>
    %15 = vector.shape_cast %12 : vector<16x128xf32> to vector<1x16x128xf32>
    tpu.vector_store %arg5[%c0_3, %c0_4, %c0_5], %15 {strides = array<i32>} : memref<1x16x128xf32, #tpu.memory_space<vmem>>, vector<1x16x128xf32>,
    return
  }
  func.func @transform_0(%arg0: i32, %arg1: i32, %arg2: memref<4xi32, #tpu.memory_space<smem>>) -> (i32, i32) {
    %c0_i32 = arith.constant 0 : i32
    %c0_i32_0 = arith.constant 0 : i32
    return %arg1, %c0_i32 : i32, i32
  }
  func.func @transform_1(%arg0: i32, %arg1: i32, %arg2: memref<4xi32, #tpu.memory_space<smem>>) -> (i32, i32) {
    %c0_i32 = arith.constant 0 : i32
    %c0_i32_0 = arith.constant 0 : i32
    %c0_i32_1 = arith.constant 0 : i32
    return %c0_i32, %c0_i32_0 : i32, i32
  }
  func.func @transform_2(%arg0: i32, %arg1: i32, %arg2: memref<4xi32, #tpu.memory_space<smem>>) -> (i32, i32, i32) {
    %c0_i32 = arith.constant 0 : i32
    %c0_i32_0 = arith.constant 0 : i32
    return %arg0, %arg1, %c0_i32 : i32, i32, i32
  }
}

</mosaic_0001>

<bundles_post_ra>
// kernel: tpu_custom_call.1
= control target key start
LH: loop header
LB: loop body
LE: loop exit
PB: predicated region body
PF: predicated region fallthrough
CT: control target
= control target key end

     0   :  { %s681_s0 = inlined_call_operand.hbm [shape: s32[4], index: 0, kind: input, shape index: {}]   ;;  %s682_s1 = inlined_call_operand.hbm [shape: f32[16,128], index: 1, kind: input, shape index: {}]   ;;  %s683_s2 = inlined_call_operand.vmem [shape: f32[1,128], index: 2, kind: input, shape index: {}]   ;;  %s684_s3 = inlined_call_operand.hbm [shape: f32[4,16,128], index: 3, kind: output, shape index: {}]  }
   0x1   :  { %s366_s14 = scalar_lea.hbm %s681_s0, 16 }
   0x2   :  { %p367_p0 = scmp.ne.s32.totalorder %s681_s0, %s366_s14  ;;  %p370_p1 = scmp.lt.u32.totalorder %s366_s14, %s681_s0 }
   0x4   :  { %p372_p2 = pnand %p370_p1, %p367_p0 }
   0x6   :  { %375 = shalt.err (!%p372_p2)  }
   0x7   :  { %s490_s19 = smov [#allocation3]  }
   0x8   :  { %9 = dma.hbm_to_smem %s681_s0, 16, %s490_s19, [#allocation2] }
   0x9   :  { %456 = dma.done.wait [#allocation2], 16 }
   0xa   :  { %457 = vsyncadd [#allocation2], 4294967280 }
   0xb   :  { %11 = sfence }
   0xc   :  { %12 = vsyncpa [#allocation5], 0 }
   0xd   :  { %13 = vsyncpa [#allocation6], 0 }
   0xe   :  { %15 = vsyncpa [#allocation6 + $0x1], 0  ;;  %s529_s22 = smov 0   ;;  %s531_s23 = smov 0  }
   0xf   :  { %s533_s24 = smov 0   ;;  %s535_s25 = smov 0  }
  0x10   :  { %s537_s26 = smov 0   ;;  %s539_s27 = smov 0  }
  0x11 LB: > { %s281_s0 = sadd.s32 4294967295, %s488_s27   ;;  %s282_s28 = sadd.s32 4294967294, %s488_s27   ;;  %s488_s27 = sphi %s539_s27, %s21_s27   ;;  %s484_s26 = sphi %s537_s26, %s702_s26   ;;  %s480_s25 = sphi %s535_s25, %s701_s25   ;;  %s476_s24 = sphi %s533_s24, %s700_s24   ;;  %s472_s23 = sphi %s531_s23, %s699_s23   ;;  %s468_s22 = sphi %s529_s22, %s698_s22  }
  0x12   : > { %s33_s29 = sadd.s32 1, %s484_s26  ;;  %s89_s30 = sadd.s32 1, %s476_s24 }
  0x13   : > { %p35_p3 = scmp.ge.s32.totalorder %s33_s29, 4  ;;  %p99_p4 = scmp.ne.s32.totalorder %s476_s24, %s472_s23 }
  0x14   : > { %p100_p5 = scmp.eq.s32.totalorder %s281_s0, 3  ;;  %p105_p6 = scmp.ne.s32.totalorder %s472_s23, %s468_s22 }
  0x15   : > { %s704_s29 = smov (%p35_p3, %s33_s29), 0  ;;  %p106_p8 = scmp.eq.s32.totalorder %s282_s28, 3 }
  0x16   : > { %p569_p7 = por %p100_p5, %p99_p4  ;;  %s84_s5 = ssub.s32 %s484_s26, %s704_s29 }
  0x17   : > { %p283_p9 = scmp.ge.s32.totalorder %s488_s27, 1  ;;  %p87_p10 = scmp.eq.s32.totalorder %s84_s5, 0 }
  0x18   : > { %s689_s4 = scalar_select %p569_p7, 1, 0 }
  0x19   : > { %p576_p11 = por %p106_p8, %p105_p6  ;;  %p113_p12 = scmp.lt.s32.totalorder %s488_s27, 5 }
  0x1a   : > { %s582_s7 = scalar_select %p87_p10, %s476_s24, %s89_s30  }
  0x1b   : > { %s690_s6 = scalar_select %p576_p11, 1, 0 }
  0x1c   : > { %p584_p13 = pnand %p283_p9, %p113_p12  ;;  %p588_p0 = scmp.eq.s32.totalorder %s281_s0, 0 }
  0x1d   : > { %s491_s10 = smov [#allocation4]   ;;  %s376_s15 = scalar_lea.hbm %s682_s1, 256 }
  0x1e   : > { %s691_s8 = scalar_select %p584_p13, 1, 0 }
  0x1f   : > { %s692_s9 = scalar_select %p588_p0, 1, 0 }
  0x20   : > { %p301_p1 = pneg %p584_p13  ;;  %s128_s11 = sshll.u32 %s491_s10, 4  ;;  %s129_s11 = int_to_ptr.vmem [resolvable:$true] %s128_s11 }
  0x21   : > { %p377_p3 = scmp.ne.s32.totalorder %s682_s1, %s376_s15  ;;  %p383_p8 = scmp.lt.u32.totalorder %s376_s15, %s682_s1 }
  0x22   : > { %p596_p2 = pnand %p588_p0, %p301_p1 }
  0x24   : > { %p378_p4 = pneg %p596_p2 }
  0x26   : > { %p379_p5 = pnand %p378_p4, %p377_p3 }
  0x28   : > { %p380_p6 = pneg %p379_p5 }
  0x2a   : > { %p385_p9 = pnand %p383_p8, %p380_p6 }
  0x2c   : > { %388 = shalt.err (!%p385_p9)
}
  0x2d   : > { %s389_s20 = scalar_lea.vmem %s129_s11, 256  ;;  %p397_p11 = scmp.lt.s32.totalorder %s129_s11, %s129_s11 }
  0x2e   : > { %p390_p10 = scmp.ne.s32.totalorder %s129_s11, %s389_s20  ;;  %p398_p7 = scmp.lt.s32.totalorder %s389_s20, %s389_s20 }
  0x30   : > { %p392_p12 = pnand %p390_p10, %p378_p4  ;;  %p399_p0 = por %p398_p7, %p397_p11 }
  0x32   : > { %p393_p1 = pneg %p392_p12 }
  0x34   : > { %p400_p13 = pnand %p399_p0, %p393_p1 }
  0x36   : > { %403 = shalt.err (!%p400_p13)
}
  0x37   : > { %s492_s21 = smov 128   ;;  %s493_s0 = smov 8  }
  0x38   : > { %304 = dma.hbm_to_vmem [thread:$0]  (!%p596_p2), %s682_s1, 256, %s129_s11, [#allocation5], %s492_s21, %s492_s21, %s493_s0  }
  0x39   : > { %p694_p3 = scmp.ne.s32.totalorder %s691_s8, 0 }
  0x3a   : > { %p695_p5 = scmp.ne.s32.totalorder (!%p694_p3), %s692_s9, 0 }
  0x3b   : > { %147 = sbr.rel (%p694_p3) target bundleno = 95 (0x5f), region = 28 }
  0x42   : > { %459 = dma.done.wait (%p695_p5), [#allocation5], 256  }
  0x43   : > { %461 = vsyncadd (%p695_p5), [#allocation5], 4294967040  ;;  %s161_s5 = sand.u32 1, %s472_s23   ;;  %v168_v0 = vlaneseq  ;;  %s166_s12 = sld [smem:[#allocation3 + %s480_s25]]  ;;  %v177_v4 = vld [vmem:[#allocation4] sm:$0xff]  ;;  %v178_v6 = vld [vmem:[#allocation4 + $0x8] sm:$0xff] }
  0x44   : > { %s287_s10 = sshll.u32 %s161_s5, 4  ;;  %s294_s11 = sshll.u32 %s480_s25, 8  ;;  %v288_v5 = vld [vmem:[%s683_s2] ss:$0 sm:$0xff] }
  0x45   : > { %v169_v1 = vshrl.u32 %v168_v0, 7  ;;  %s163_s13 = scalar_lea.vmem [#allocation7], %s287_s10  ;;  %s633_s17 = scalar_lea.hbm %s684_s3, %s294_s11 }
  0x46   : > { %s206_s14 = sshll.u32 %s163_s13, 4  ;;  %s635_s25 = scalar_lea.sflag [#allocation6], %s161_s5  ;;  %s628_s14 = int_to_ptr.vmem [resolvable:$true] %s206_s14 }
  0x47   : > { %v170_v2 = vadd.s32 8, %v169_v1  ;;  %s404_s18 = scalar_lea.vmem %s628_s14, 256  ;;  %p696_p11 = scmp.ne.s32.totalorder %s689_s4, 0 }
  0x48   : > { %p405_p7 = scmp.ne.s32.totalorder %s628_s14, %s404_s18  ;;  %s494_s19 = smov [#allocation7]  }
  0x49   : > { %v174_v3 = vstv %s166_s12  ;;  %s408_s20 = sshll.u32 %s494_s19, 4  ;;  %s409_s20 = int_to_ptr.vmem [resolvable:$false] %s408_s20 }
  0x4a   : > { %vm175_vm0 = vcmp.lt.s32.totalorder %v169_v1, %v174_v3  ;;  %vm176_vm1 = vcmp.lt.s32.totalorder %v170_v2, %v174_v3  ;;  %p406_p13 = pnand %p405_p7, %p696_p11  ;;  %s410_s21 = scalar_lea.vmem %s409_s20, 512 }
  0x4b   : > { %v186_v7 = vsel %vm175_vm0, %v177_v4, %v288_v5  ;;  %v187_v8 = vsel %vm176_vm1, %v178_v6, %v288_v5  ;;  %p411_p2 = scmp.lt.s32.totalorder %s628_s14, %s409_s20  ;;  %p412_p4 = scmp.lt.s32.totalorder %s410_s21, %s404_s18 }
  0x4c   : > { %188 = vst [vmem:[%s163_s13] sm:$0xff] %v186_v7  ;;  %189 = vst [vmem:[%s163_s13 + $0x8] sm:$0xff] %v187_v8  ;;  %p407_p0 = pneg %p406_p13 }
  0x4d   : > { %p413_p6 = por %p412_p4, %p411_p2 }
  0x4f   : > { %p414_p8 = pnand %p413_p6, %p407_p0 }
  0x51   : > { %417 = shalt.err (!%p414_p8)
}
  0x52   : > { %s418_s0 = scalar_lea.hbm %s633_s17, 256  ;;  %s422_s5 = scalar_lea.hbm %s684_s3, 1024 }
  0x53   : > { %p419_p9 = scmp.ne.s32.totalorder %s633_s17, %s418_s0  ;;  %p423_p1 = scmp.lt.u32.totalorder %s633_s17, %s684_s3 }
  0x54   : > { %p424_p3 = scmp.lt.u32.totalorder %s422_s5, %s418_s0  ;;  %p426_p7 = scmp.lt.u32.totalorder %s418_s0, %s633_s17 }
  0x55   : > { %p420_p10 = pnand %p419_p9, %p696_p11 }
  0x56   : > { %p425_p5 = por %p424_p3, %p423_p1 }
  0x57   : > { %p421_p12 = pneg %p420_p10 }
  0x58   : > { %p427_p13 = por %p426_p7, %p425_p5 }
  0x5a   : > { %p428_p0 = pnand %p427_p13, %p421_p12 }
  0x5c   : > { %431 = shalt.err (!%p428_p0)
}
  0x5d   : > { %s495_s13 = smov 128   ;;  %s496_s11 = smov 8  }
  0x5e   : > { %299 = dma.vmem_to_hbm [thread:$0]  (%p696_p11), %s628_s14, 256, %s633_s17, %s635_s25, %s495_s13, %s495_s13, %s496_s11  }
  0x5f PF: > { %p311_p2 = scmp.ge.s32.totalorder %s488_s27, 2  ;;  %s221_s8 = sand.u32 1, %s468_s22  }
  0x60   : > { %p697_p4 = scmp.ne.s32.totalorder %s690_s6, 0  ;;  %s222_s15 = scalar_lea.sflag [#allocation6], %s221_s8 }
  0x62   : > { %p306_p6 = pnand %p311_p2, %p697_p4 }
  0x64   : > { %463 = dma.done.wait (!%p306_p6), %s222_s15, 256  }
  0x65   : > { %465 = vsyncadd (!%p306_p6), %s222_s15, 4294967040  ;;  %s21_s27 = sadd.s32 1, %s488_s27   ;;  %s698_s22 = smov %s472_s23 }
  0x66   : > { %p18_p8 = scmp.ge.s32.totalorder %s21_s27, 6   ;;  %s699_s23 = smov %s476_s24 }
  0x67   : > { %s700_s24 = smov %s582_s7  ;;  %s701_s25 = smov %s484_s26 }
  0x68   : > { %s702_s26 = smov %s704_s29  ;;  %20 = sbr.rel (!%p18_p8) target bundleno = 17 (0x11), region = 66 }
  0x6f   :  { %227 = vsyncpa [#allocation5], 1 }
  0x70   :  { %229 = vsyncpa [#allocation5 + $0x1], 1 }
  0x71   :  { %230 = vsyncpa [#allocation6], 1 }
  0x72   :  { %232 = vsyncpa [#allocation6 + $0x1], 1 }

</bundles_post_ra>
